<compile_context>
chip_gen: v7x
topology: tpu7x:2x2x1
jax: 0.10.0
libtpu: 0.0.40
codegen_flags: <defaults>
</compile_context>

<pallas_src>
import jax
import jax.numpy as jnp
from jax.experimental import pallas as pl
from jax.experimental.pallas import tpu as pltpu

LANES = 128  # vertex (lane) axis width; synthetic meshes use exactly 128 verts


# ---------------------------------------------------------------------------
# Fused kernel: per-image rigid transform + zbuf + global znear/zfar
# ---------------------------------------------------------------------------
def render_fwd_kernel(labels_ref, rot_ref, trans_ref, mesh_ref,
                      pts_ref, zbuf_ref, zlim_ref):
    # labels_ref : SMEM (B,)        int32  mesh id per image
    # rot_ref    : SMEM (B, 9)      f32    row-major 3x3 rotation per image
    # trans_ref  : SMEM (B, 3)      f32    translation per image
    # mesh_ref   : VMEM (M, 3, Vp)  f32    vertex table, coord-major, lane-padded
    # pts_ref    : VMEM (B, 3, Vp)  f32    camera-space points (x, y, z rows)
    # zbuf_ref   : VMEM (B, Vp)     f32    camera-space depths (row 2 of pts)
    # zlim_ref   : VMEM (2, Vp)     f32    row0 = znear (bcast), row1 = zfar (bcast)
    B = pts_ref.shape[0]
    Vp = pts_ref.shape[2]

    zmin = None
    zmax = None
    for b in range(B):  # B is static & small — full unroll for LLO visibility
        lbl = labels_ref[b]                       # scalar gather index from SMEM
        v = mesh_ref[lbl]                         # (3, Vp) dynamic gather from table
        vx = v[0:1, :]
        vy = v[1:2, :]
        vz = v[2:3, :]
        tx = trans_ref[b, 0]
        ty = trans_ref[b, 1]
        tz = trans_ref[b, 2]
        # VPU formulation: 9 scalar*vector mults + adds per image (no MXU).
        px = rot_ref[b, 0] * vx + rot_ref[b, 1] * vy + rot_ref[b, 2] * vz + tx
        py = rot_ref[b, 3] * vx + rot_ref[b, 4] * vy + rot_ref[b, 5] * vz + ty
        pz = rot_ref[b, 6] * vx + rot_ref[b, 7] * vy + rot_ref[b, 8] * vz + tz

        pts_ref[b] = jnp.concatenate([px, py, pz], axis=0)     # (3, Vp) store
        zbuf_ref[pl.ds(b, 1), :] = pz                          # (1, Vp) store

        bmin = jnp.min(pz, axis=1, keepdims=True)              # (1, 1)
        bmax = jnp.max(pz, axis=1, keepdims=True)
        zmin = bmin if zmin is None else jnp.minimum(zmin, bmin)
        zmax = bmax if zmax is None else jnp.maximum(zmax, bmax)

    # znear = floor(zmin / 100) * 100 ; zfar = (floor(zmax / 100) + 1) * 100
    znear = jnp.floor(zmin / 100.0) * 100.0
    zfar = (jnp.floor(zmax / 100.0) + 1.0) * 100.0
    zlim_ref[...] = jnp.concatenate(
        [jnp.broadcast_to(znear, (1, Vp)), jnp.broadcast_to(zfar, (1, Vp))],
        axis=0)


def render_forward(labels, rotations, translations, mesh_table):
    """labels (B,), rotations (B,3,3), translations (B,3),
    mesh_table (M,3,Vp) -> pts (B,3,Vp), zbuf (B,Vp), zlim (2,Vp)."""
    B = labels.shape[0]
    Vp = mesh_table.shape[2]
    rot_flat = rotations.reshape(B, 9).astype(jnp.float32)
    trans = translations.astype(jnp.float32)
    labels = labels.astype(jnp.int32)

    pts, zbuf, zlim = pl.pallas_call(
        render_fwd_kernel,
        out_shape=(jax.ShapeDtypeStruct((B, 3, Vp), jnp.float32),
                   jax.ShapeDtypeStruct((B, Vp), jnp.float32),
                   jax.ShapeDtypeStruct((2, Vp), jnp.float32)),
        in_specs=[pl.BlockSpec(memory_space=pltpu.MemorySpace.SMEM),   # labels
                  pl.BlockSpec(memory_space=pltpu.MemorySpace.SMEM),   # rotations
                  pl.BlockSpec(memory_space=pltpu.MemorySpace.SMEM),   # translations
                  pl.BlockSpec(memory_space=pltpu.MemorySpace.VMEM)],  # mesh table
        out_specs=(pl.BlockSpec(memory_space=pltpu.MemorySpace.VMEM),
                   pl.BlockSpec(memory_space=pltpu.MemorySpace.VMEM),
                   pl.BlockSpec(memory_space=pltpu.MemorySpace.VMEM)),
    )(labels, rot_flat, trans, mesh_table)
    return pts, zbuf, zlim


# ---------------------------------------------------------------------------
# cameras_from_opencv_projection — plain jnp (elementwise, XLA-fused; a Pallas
# launch for ~16 scalars per image costs more than the math itself).
# ---------------------------------------------------------------------------
def cameras_from_opencv_projection_jnp(R, tvec, camera_matrix, image_size):
    R = R.astype(jnp.float32)
    tvec = tvec.astype(jnp.float32)
    camera_matrix = camera_matrix.astype(jnp.float32)

    focal_length = jnp.stack([camera_matrix[:, 0, 0], camera_matrix[:, 1, 1]],
                             axis=-1)
    principal_point = camera_matrix[:, :2, 2]
    image_size_wh = image_size.astype(jnp.float32)[:, ::-1]        # (H,W)->(W,H)
    scale = (jnp.min(image_size_wh, axis=1, keepdims=True) - 1.0) / 2.0
    c0 = (image_size_wh - 1.0) / 2.0
    focal_p3d = focal_length / scale
    p0_p3d = -(principal_point - c0) / scale
    R_p3d = jnp.transpose(R, (0, 2, 1)).at[:, :, :2].multiply(-1.0)
    T_p3d = tvec.at[:, :2].multiply(-1.0)
    return dict(R=R_p3d, T=T_p3d, focal_length=focal_p3d,
                principal_point=p0_p3d, image_size=image_size)


# ---------------------------------------------------------------------------
# Renderer equivalent
# ---------------------------------------------------------------------------
class RendererPallas:
    def __init__(self, image_size=(16, 16), num_meshes=3, verts_per_mesh=LANES,
                 seed=0):
        self.image_size = image_size
        self.num_verts = verts_per_mesh
        # Synthetic deterministic meshes (replaces load_meshes / .ply reading):
        key = jax.random.PRNGKey(seed)
        verts = jax.random.uniform(key, (num_meshes, verts_per_mesh, 3),
                                   minval=-50.0, maxval=50.0, dtype=jnp.float32)
        # Coord-major, lane-padded table (M, 3, Vp), built ONCE here. Pad lanes
        # replicate the last real vertex so in-kernel min/max stay correct.
        Vp = ((verts_per_mesh + LANES - 1) // LANES) * LANES
        table = jnp.transpose(verts, (0, 2, 1))                     # (M, 3, V)
        if Vp != verts_per_mesh:
            pad = jnp.broadcast_to(table[:, :, -1:],
                                   (num_meshes, 3, Vp - verts_per_mesh))
            table = jnp.concatenate([table, pad], axis=-1)
        self.mesh_table = table                                     # (M, 3, Vp)

    def __call__(self, rotations, translations, internel_k, labels):
        assert (rotations.shape[0] == translations.shape[0]
                == internel_k.shape[0] == labels.shape[0])
        B = rotations.shape[0]

        pts, zbuf_bv, zlim = render_forward(labels, rotations, translations,
                                            self.mesh_table)
        znear = zlim[0, 0]
        zfar = zlim[1, 0]
        # torch.cat of per-image depth rows -> flat (B * V,)
        zbuf = zbuf_bv[:, :self.num_verts].reshape(-1)

        image_size = jnp.broadcast_to(
            jnp.asarray(self.image_size, jnp.float32)[None], (B, 2))
        cameras = cameras_from_opencv_projection_jnp(
            rotations, translations, internel_k, image_size)

        # TODO(synk): PyTorch3D MeshRasterizer + Hard/SoftPhongShader /
        # SoftSilhouetteShader (images, masks, fragments) and PointLights have
        # no clean Pallas equivalent; they are not reproduced here.
        return dict(points_3d=pts[:, :, :self.num_verts],   # (B, 3, V)
                    zbuf=zbuf,
                    znear=znear, zfar=zfar,
                    cameras=cameras)


# ---------------------------------------------------------------------------
if __name__ == "__main__":
    key = jax.random.PRNGKey(0)
    k_ang, k_txy, k_tz = jax.random.split(key, 3)
    B = 2

    # Deterministic valid rotation matrices (rotations about the z-axis).
    angles = jax.random.uniform(k_ang, (B,), minval=0.0, maxval=2.0 * jnp.pi)
    c, s = jnp.cos(angles), jnp.sin(angles)
    z0, o1 = jnp.zeros_like(c), jnp.ones_like(c)
    rotations = jnp.stack([jnp.stack([c, -s, z0], -1),
                           jnp.stack([s, c, z0], -1),
                           jnp.stack([z0, z0, o1], -1)], axis=1)        # (B,3,3)

    translations = jnp.concatenate(
        [jax.random.uniform(k_txy, (B, 2), minval=-10.0, maxval=10.0),
         jax.random.uniform(k_tz, (B, 1), minval=400.0, maxval=700.0)],
        axis=-1).astype(jnp.float32)                                    # (B,3)

    internel_k = jnp.zeros((B, 3, 3), jnp.float32)
    internel_k = internel_k.at[:, 0, 0].set(120.0)   # fx
    internel_k = internel_k.at[:, 1, 1].set(118.0)   # fy
    internel_k = internel_k.at[:, 0, 2].set(8.0)     # cx
    internel_k = internel_k.at[:, 1, 2].set(8.0)     # cy
    internel_k = internel_k.at[:, 2, 2].set(1.0)

    labels = jnp.array([0, 2], dtype=jnp.int32)

    renderer = RendererPallas(image_size=(16, 16))
    out = renderer(rotations, translations, internel_k, labels)
    jax.block_until_ready(out)
    print("KERNEL_OK")
</pallas_src>

<mosaic_0001>
module attributes {stable_mosaic.version = 11 : i64} {
  func.func @render_fwd_kernel(%arg0: memref<2xi32, #tpu.memory_space<smem>>, %arg1: memref<2x9xf32, #tpu.memory_space<smem>>, %arg2: memref<2x3xf32, #tpu.memory_space<smem>>, %arg3: memref<3x3x128xf32, #tpu.memory_space<vmem>>, %arg4: memref<2x3x128xf32, #tpu.memory_space<vmem>>, %arg5: memref<2x128xf32, #tpu.memory_space<vmem>>, %arg6: memref<2x128xf32, #tpu.memory_space<vmem>>) attributes {dimension_semantics = [], scalar_prefetch = 0 : i64, scratch_operands = 0 : i64, tpu.core_type = #tpu.core_type<tc>} {
    %c0 = arith.constant 0 : index
    %0 = memref.load %arg0[%c0] : memref<2xi32, #tpu.memory_space<smem>>
    %1 = arith.index_cast %0 : i32 to index
    %c0_0 = arith.constant 0 : index
    %c0_1 = arith.constant 0 : index
    %2 = vector.load %arg3[%1, %c0_0, %c0_1] : memref<3x3x128xf32, #tpu.memory_space<vmem>>, vector<1x3x128xf32>
    %3 = vector.shape_cast %2 : vector<1x3x128xf32> to vector<3x128xf32>
    %4 = vector.extract_strided_slice %3 {offsets = [0, 0], sizes = [1, 128], strides = [1, 1]} : vector<3x128xf32> to vector<1x128xf32>
    %5 = vector.extract_strided_slice %3 {offsets = [1, 0], sizes = [1, 128], strides = [1, 1]} : vector<3x128xf32> to vector<1x128xf32>
    %6 = vector.extract_strided_slice %3 {offsets = [2, 0], sizes = [1, 128], strides = [1, 1]} : vector<3x128xf32> to vector<1x128xf32>
    %c0_2 = arith.constant 0 : index
    %c0_3 = arith.constant 0 : index
    %7 = memref.load %arg2[%c0_2, %c0_3] : memref<2x3xf32, #tpu.memory_space<smem>>
    %c0_4 = arith.constant 0 : index
    %c1 = arith.constant 1 : index
    %8 = memref.load %arg2[%c0_4, %c1] : memref<2x3xf32, #tpu.memory_space<smem>>
    %c0_5 = arith.constant 0 : index
    %c2 = arith.constant 2 : index
    %9 = memref.load %arg2[%c0_5, %c2] : memref<2x3xf32, #tpu.memory_space<smem>>
    %c0_6 = arith.constant 0 : index
    %c0_7 = arith.constant 0 : index
    %10 = memref.load %arg1[%c0_6, %c0_7] : memref<2x9xf32, #tpu.memory_space<smem>>
    %11 = vector.broadcast %10 : f32 to vector<1x128xf32>
    %12 = arith.mulf %11, %4 : vector<1x128xf32>
    %c0_8 = arith.constant 0 : index
    %c1_9 = arith.constant 1 : index
    %13 = memref.load %arg1[%c0_8, %c1_9] : memref<2x9xf32, #tpu.memory_space<smem>>
    %14 = vector.broadcast %13 : f32 to vector<1x128xf32>
    %15 = arith.mulf %14, %5 : vector<1x128xf32>
    %16 = arith.addf %12, %15 : vector<1x128xf32>
    %c0_10 = arith.constant 0 : index
    %c2_11 = arith.constant 2 : index
    %17 = memref.load %arg1[%c0_10, %c2_11] : memref<2x9xf32, #tpu.memory_space<smem>>
    %18 = vector.broadcast %17 : f32 to vector<1x128xf32>
    %19 = arith.mulf %18, %6 : vector<1x128xf32>
    %20 = arith.addf %16, %19 : vector<1x128xf32>
    %21 = vector.broadcast %7 : f32 to vector<1x128xf32>
    %22 = arith.addf %20, %21 : vector<1x128xf32>
    %c0_12 = arith.constant 0 : index
    %c3 = arith.constant 3 : index
    %23 = memref.load %arg1[%c0_12, %c3] : memref<2x9xf32, #tpu.memory_space<smem>>
    %24 = vector.broadcast %23 : f32 to vector<1x128xf32>
    %25 = arith.mulf %24, %4 : vector<1x128xf32>
    %c0_13 = arith.constant 0 : index
    %c4 = arith.constant 4 : index
    %26 = memref.load %arg1[%c0_13, %c4] : memref<2x9xf32, #tpu.memory_space<smem>>
    %27 = vector.broadcast %26 : f32 to vector<1x128xf32>
    %28 = arith.mulf %27, %5 : vector<1x128xf32>
    %29 = arith.addf %25, %28 : vector<1x128xf32>
    %c0_14 = arith.constant 0 : index
    %c5 = arith.constant 5 : index
    %30 = memref.load %arg1[%c0_14, %c5] : memref<2x9xf32, #tpu.memory_space<smem>>
    %31 = vector.broadcast %30 : f32 to vector<1x128xf32>
    %32 = arith.mulf %31, %6 : vector<1x128xf32>
    %33 = arith.addf %29, %32 : vector<1x128xf32>
    %34 = vector.broadcast %8 : f32 to vector<1x128xf32>
    %35 = arith.addf %33, %34 : vector<1x128xf32>
    %c0_15 = arith.constant 0 : index
    %c6 = arith.constant 6 : index
    %36 = memref.load %arg1[%c0_15, %c6] : memref<2x9xf32, #tpu.memory_space<smem>>
    %37 = vector.broadcast %36 : f32 to vector<1x128xf32>
    %38 = arith.mulf %37, %4 : vector<1x128xf32>
    %c0_16 = arith.constant 0 : index
    %c7 = arith.constant 7 : index
    %39 = memref.load %arg1[%c0_16, %c7] : memref<2x9xf32, #tpu.memory_space<smem>>
    %40 = vector.broadcast %39 : f32 to vector<1x128xf32>
    %41 = arith.mulf %40, %5 : vector<1x128xf32>
    %42 = arith.addf %38, %41 : vector<1x128xf32>
    %c0_17 = arith.constant 0 : index
    %c8 = arith.constant 8 : index
    %43 = memref.load %arg1[%c0_17, %c8] : memref<2x9xf32, #tpu.memory_space<smem>>
    %44 = vector.broadcast %43 : f32 to vector<1x128xf32>
    %45 = arith.mulf %44, %6 : vector<1x128xf32>
    %46 = arith.addf %42, %45 : vector<1x128xf32>
    %47 = vector.broadcast %9 : f32 to vector<1x128xf32>
    %48 = arith.addf %46, %47 : vector<1x128xf32>
    %49 = tpu.concatenate %22, %35, %48 in 0 : vector<1x128xf32>, vector<1x128xf32>, vector<1x128xf32> -> vector<3x128xf32>
    %c0_18 = arith.constant 0 : index
    %c0_19 = arith.constant 0 : index
    %c0_20 = arith.constant 0 : index
    %50 = vector.load %arg4[%c0_18, %c0_19, %c0_20] : memref<2x3x128xf32, #tpu.memory_space<vmem>>, vector<1x3x128xf32>
    %51 = vector.shape_cast %50 : vector<1x3x128xf32> to vector<3x128xf32>
    %52 = vector.shape_cast %49 : vector<3x128xf32> to vector<1x3x128xf32>
    tpu.vector_store %arg4[%c0_18, %c0_19, %c0_20], %52 {strides = array<i32>} : memref<2x3x128xf32, #tpu.memory_space<vmem>>, vector<1x3x128xf32>,
    %c0_21 = arith.constant 0 : index
    %c0_22 = arith.constant 0 : index
    %53 = vector.load %arg5[%c0_21, %c0_22] : memref<2x128xf32, #tpu.memory_space<vmem>>, vector<1x128xf32>
    tpu.vector_store %arg5[%c0_21, %c0_22], %48 {strides = array<i32>} : memref<2x128xf32, #tpu.memory_space<vmem>>, vector<1x128xf32>,
    %cst = arith.constant dense<0x7F800000> : vector<1xf32>
    %54 = vector.multi_reduction <minimumf>, %48, %cst [1] : vector<1x128xf32> to vector<1xf32>
    %55 = vector.shape_cast %54 : vector<1xf32> to vector<1x1xf32>
    %cst_23 = arith.constant dense<0xFF800000> : vector<1xf32>
    %56 = vector.multi_reduction <maximumf>, %48, %cst_23 [1] : vector<1x128xf32> to vector<1xf32>
    %57 = vector.shape_cast %56 : vector<1xf32> to vector<1x1xf32>
    %c1_24 = arith.constant 1 : index
    %58 = memref.load %arg0[%c1_24] : memref<2xi32, #tpu.memory_space<smem>>
    %59 = arith.index_cast %58 : i32 to index
    %c0_25 = arith.constant 0 : index
    %c0_26 = arith.constant 0 : index
    %60 = vector.load %arg3[%59, %c0_25, %c0_26] : memref<3x3x128xf32, #tpu.memory_space<vmem>>, vector<1x3x128xf32>
    %61 = vector.shape_cast %60 : vector<1x3x128xf32> to vector<3x128xf32>
    %62 = vector.extract_strided_slice %61 {offsets = [0, 0], sizes = [1, 128], strides = [1, 1]} : vector<3x128xf32> to vector<1x128xf32>
    %63 = vector.extract_strided_slice %61 {offsets = [1, 0], sizes = [1, 128], strides = [1, 1]} : vector<3x128xf32> to vector<1x128xf32>
    %64 = vector.extract_strided_slice %61 {offsets = [2, 0], sizes = [1, 128], strides = [1, 1]} : vector<3x128xf32> to vector<1x128xf32>
    %c1_27 = arith.constant 1 : index
    %c0_28 = arith.constant 0 : index
    %65 = memref.load %arg2[%c1_27, %c0_28] : memref<2x3xf32, #tpu.memory_space<smem>>
    %c1_29 = arith.constant 1 : index
    %c1_30 = arith.constant 1 : index
    %66 = memref.load %arg2[%c1_29, %c1_30] : memref<2x3xf32, #tpu.memory_space<smem>>
    %c1_31 = arith.constant 1 : index
    %c2_32 = arith.constant 2 : index
    %67 = memref.load %arg2[%c1_31, %c2_32] : memref<2x3xf32, #tpu.memory_space<smem>>
    %c1_33 = arith.constant 1 : index
    %c0_34 = arith.constant 0 : index
    %68 = memref.load %arg1[%c1_33, %c0_34] : memref<2x9xf32, #tpu.memory_space<smem>>
    %69 = vector.broadcast %68 : f32 to vector<1x128xf32>
    %70 = arith.mulf %69, %62 : vector<1x128xf32>
    %c1_35 = arith.constant 1 : index
    %c1_36 = arith.constant 1 : index
    %71 = memref.load %arg1[%c1_35, %c1_36] : memref<2x9xf32, #tpu.memory_space<smem>>
    %72 = vector.broadcast %71 : f32 to vector<1x128xf32>
    %73 = arith.mulf %72, %63 : vector<1x128xf32>
    %74 = arith.addf %70, %73 : vector<1x128xf32>
    %c1_37 = arith.constant 1 : index
    %c2_38 = arith.constant 2 : index
    %75 = memref.load %arg1[%c1_37, %c2_38] : memref<2x9xf32, #tpu.memory_space<smem>>
    %76 = vector.broadcast %75 : f32 to vector<1x128xf32>
    %77 = arith.mulf %76, %64 : vector<1x128xf32>
    %78 = arith.addf %74, %77 : vector<1x128xf32>
    %79 = vector.broadcast %65 : f32 to vector<1x128xf32>
    %80 = arith.addf %78, %79 : vector<1x128xf32>
    %c1_39 = arith.constant 1 : index
    %c3_40 = arith.constant 3 : index
    %81 = memref.load %arg1[%c1_39, %c3_40] : memref<2x9xf32, #tpu.memory_space<smem>>
    %82 = vector.broadcast %81 : f32 to vector<1x128xf32>
    %83 = arith.mulf %82, %62 : vector<1x128xf32>
    %c1_41 = arith.constant 1 : index
    %c4_42 = arith.constant 4 : index
    %84 = memref.load %arg1[%c1_41, %c4_42] : memref<2x9xf32, #tpu.memory_space<smem>>
    %85 = vector.broadcast %84 : f32 to vector<1x128xf32>
    %86 = arith.mulf %85, %63 : vector<1x128xf32>
    %87 = arith.addf %83, %86 : vector<1x128xf32>
    %c1_43 = arith.constant 1 : index
    %c5_44 = arith.constant 5 : index
    %88 = memref.load %arg1[%c1_43, %c5_44] : memref<2x9xf32, #tpu.memory_space<smem>>
    %89 = vector.broadcast %88 : f32 to vector<1x128xf32>
    %90 = arith.mulf %89, %64 : vector<1x128xf32>
    %91 = arith.addf %87, %90 : vector<1x128xf32>
    %92 = vector.broadcast %66 : f32 to vector<1x128xf32>
    %93 = arith.addf %91, %92 : vector<1x128xf32>
    %c1_45 = arith.constant 1 : index
    %c6_46 = arith.constant 6 : index
    %94 = memref.load %arg1[%c1_45, %c6_46] : memref<2x9xf32, #tpu.memory_space<smem>>
    %95 = vector.broadcast %94 : f32 to vector<1x128xf32>
    %96 = arith.mulf %95, %62 : vector<1x128xf32>
    %c1_47 = arith.constant 1 : index
    %c7_48 = arith.constant 7 : index
    %97 = memref.load %arg1[%c1_47, %c7_48] : memref<2x9xf32, #tpu.memory_space<smem>>
    %98 = vector.broadcast %97 : f32 to vector<1x128xf32>
    %99 = arith.mulf %98, %63 : vector<1x128xf32>
    %100 = arith.addf %96, %99 : vector<1x128xf32>
    %c1_49 = arith.constant 1 : index
    %c8_50 = arith.constant 8 : index
    %101 = memref.load %arg1[%c1_49, %c8_50] : memref<2x9xf32, #tpu.memory_space<smem>>
    %102 = vector.broadcast %101 : f32 to vector<1x128xf32>
    %103 = arith.mulf %102, %64 : vector<1x128xf32>
    %104 = arith.addf %100, %103 : vector<1x128xf32>
    %105 = vector.broadcast %67 : f32 to vector<1x128xf32>
    %106 = arith.addf %104, %105 : vector<1x128xf32>
    %107 = tpu.concatenate %80, %93, %106 in 0 : vector<1x128xf32>, vector<1x128xf32>, vector<1x128xf32> -> vector<3x128xf32>
    %c1_51 = arith.constant 1 : index
    %c0_52 = arith.constant 0 : index
    %c0_53 = arith.constant 0 : index
    %108 = vector.load %arg4[%c1_51, %c0_52, %c0_53] : memref<2x3x128xf32, #tpu.memory_space<vmem>>, vector<1x3x128xf32>
    %109 = vector.shape_cast %108 : vector<1x3x128xf32> to vector<3x128xf32>
    %110 = vector.shape_cast %107 : vector<3x128xf32> to vector<1x3x128xf32>
    tpu.vector_store %arg4[%c1_51, %c0_52, %c0_53], %110 {strides = array<i32>} : memref<2x3x128xf32, #tpu.memory_space<vmem>>, vector<1x3x128xf32>,
    %c1_54 = arith.constant 1 : index
    %c0_55 = arith.constant 0 : index
    %111 = vector.load %arg5[%c1_54, %c0_55] : memref<2x128xf32, #tpu.memory_space<vmem>>, vector<1x128xf32>
    tpu.vector_store %arg5[%c1_54, %c0_55], %106 {strides = array<i32>} : memref<2x128xf32, #tpu.memory_space<vmem>>, vector<1x128xf32>,
    %cst_56 = arith.constant dense<0x7F800000> : vector<1xf32>
    %112 = vector.multi_reduction <minimumf>, %106, %cst_56 [1] : vector<1x128xf32> to vector<1xf32>
    %113 = vector.shape_cast %112 : vector<1xf32> to vector<1x1xf32>
    %cst_57 = arith.constant dense<0xFF800000> : vector<1xf32>
    %114 = vector.multi_reduction <maximumf>, %106, %cst_57 [1] : vector<1x128xf32> to vector<1xf32>
    %115 = vector.shape_cast %114 : vector<1xf32> to vector<1x1xf32>
    %116 = arith.minimumf %55, %113 : vector<1x1xf32>
    %117 = arith.maximumf %57, %115 : vector<1x1xf32>
    %cst_58 = arith.constant 1.000000e+02 : f32
    %118 = vector.broadcast %cst_58 : f32 to vector<1x1xf32>
    %119 = arith.divf %116, %118 : vector<1x1xf32>
    %120 = math.floor %119 : vector<1x1xf32>
    %cst_59 = arith.constant 1.000000e+02 : f32
    %121 = vector.broadcast %cst_59 : f32 to vector<1x1xf32>
    %122 = arith.mulf %120, %121 : vector<1x1xf32>
    %cst_60 = arith.constant 1.000000e+02 : f32
    %123 = vector.broadcast %cst_60 : f32 to vector<1x1xf32>
    %124 = arith.divf %117, %123 : vector<1x1xf32>
    %125 = math.floor %124 : vector<1x1xf32>
    %cst_61 = arith.constant 1.000000e+00 : f32
    %126 = vector.broadcast %cst_61 : f32 to vector<1x1xf32>
    %127 = arith.addf %125, %126 : vector<1x1xf32>
    %cst_62 = arith.constant 1.000000e+02 : f32
    %128 = vector.broadcast %cst_62 : f32 to vector<1x1xf32>
    %129 = arith.mulf %127, %128 : vector<1x1xf32>
    %130 = vector.shape_cast %122 : vector<1x1xf32> to vector<1x1xf32>
    %131 = vector.broadcast %130 : vector<1x1xf32> to vector<1x128xf32>
    %132 = vector.shape_cast %129 : vector<1x1xf32> to vector<1x1xf32>
    %133 = vector.broadcast %132 : vector<1x1xf32> to vector<1x128xf32>
    %134 = tpu.concatenate %131, %133 in 0 : vector<1x128xf32>, vector<1x128xf32> -> vector<2x128xf32>
    %c0_63 = arith.constant 0 : index
    %c0_64 = arith.constant 0 : index
    %135 = vector.load %arg6[%c0_63, %c0_64] : memref<2x128xf32, #tpu.memory_space<vmem>>, vector<2x128xf32>
    tpu.vector_store %arg6[%c0_63, %c0_64], %134 {strides = array<i32>} : memref<2x128xf32, #tpu.memory_space<vmem>>, vector<2x128xf32>,
    return
  }
}

</mosaic_0001>

<bundles_post_ra>
// kernel: tpu_custom_call.1
= control target key start
LH: loop header
LB: loop body
LE: loop exit
PB: predicated region body
PF: predicated region fallthrough
CT: control target
= control target key end

     0   :  { %12 = vsyncpa [#allocation5], 0  ;;  %s595_s0 = inlined_call_operand.hbm [shape: s32[2], index: 0, kind: input, shape index: {}]   ;;  %s596_s1 = inlined_call_operand.vmem [shape: f32[2,9], index: 1, kind: input, shape index: {}]   ;;  %s597_s2 = inlined_call_operand.vmem [shape: f32[2,3], index: 2, kind: input, shape index: {}]   ;;  %s598_s3 = inlined_call_operand.hbm [shape: f32[3,3,128], index: 3, kind: input, shape index: {}]   ;;  %s599_s4 = inlined_call_operand.vmem [shape: f32[2,3,128], index: 4, kind: output, shape index: {0}]   ;;  %s600_s5 = inlined_call_operand.hbm [shape: f32[2,128], index: 5, kind: output, shape index: {1}]   ;;  %s601_s6 = inlined_call_operand.hbm [shape: f32[2,128], index: 6, kind: output, shape index: {2}]  }
   0x1   :  { %13 = vsyncpa [#allocation6], 0 }
   0x2   :  { %14 = vsyncpa [#allocation9], 0 }
   0x3   :  { %15 = vsyncpa [#allocation3], 0 }
   0x4   :  { %16 = vsyncpa [#allocation4], 0 }
   0x5   :  { %17 = vsyncpa [#allocation13], 0  ;;  %s32_s23 = sshll.u32 %s596_s1, 4  ;;  %s323_s26 = scalar_lea.hbm %s595_s0, 16  ;;  %s33_s23 = int_to_ptr.vmem [resolvable:$true] %s32_s23 }
   0x6   :  { %p324_p0 = scmp.ne.s32.totalorder %s595_s0, %s323_s26  ;;  %p327_p1 = scmp.lt.u32.totalorder %s323_s26, %s595_s0 }
   0x8   :  { %p329_p2 = pnand %p327_p1, %p324_p0 }
   0xa   :  { %332 = shalt.err (!%p329_p2)
}
   0xb   :  { %s435_s7 = smov [#allocation2]   ;;  %s333_s1 = scalar_lea.vmem %s33_s23, 32 }
   0xc   :  { %25 = dma.hbm_to_smem %s595_s0, 16, %s435_s7, [#allocation5]  }
   0xd   :  { %p334_p3 = scmp.ne.s32.totalorder %s33_s23, %s333_s1  ;;  %p338_p4 = scmp.lt.s32.totalorder %s33_s23, %s33_s23 }
   0xe   :  { %p339_p5 = scmp.lt.s32.totalorder %s333_s1, %s333_s1 }
  0x10   :  { %p340_p6 = por %p339_p5, %p338_p4 }
  0x12   :  { %p341_p7 = pnand %p340_p6, %p334_p3 }
  0x14   :  { %344 = shalt.err (!%p341_p7)
}
  0x15   :  { %s436_s10 = smov [#allocation7]   ;;  %s42_s13 = sshll.u32 %s597_s2, 4  ;;  %s43_s13 = int_to_ptr.vmem [resolvable:$true] %s42_s13 }
  0x16   :  { %35 = dma.vmem_to_smem %s33_s23, 32, %s436_s10, [#allocation6]  }
  0x17   :  { %s345_s14 = scalar_lea.vmem %s43_s13, 32  ;;  %p350_p9 = scmp.lt.s32.totalorder %s43_s13, %s43_s13 }
  0x18   :  { %p346_p8 = scmp.ne.s32.totalorder %s43_s13, %s345_s14  ;;  %p351_p10 = scmp.lt.s32.totalorder %s345_s14, %s345_s14 }
  0x1a   :  { %p352_p11 = por %p351_p10, %p350_p9 }
  0x1c   :  { %p353_p12 = pnand %p352_p11, %p346_p8 }
  0x1e   :  { %356 = shalt.err (!%p353_p12)
}
  0x1f   :  { %s437_s0 = smov [#allocation8]   ;;  %s438_s15 = smov [#allocation10]  }
  0x20   :  { %45 = dma.vmem_to_smem %s43_s13, 32, %s437_s0, [#allocation9]  }
  0x21   :  { %s51_s16 = sshll.u32 %s438_s15, 4  ;;  %s357_s19 = scalar_lea.hbm %s598_s3, 192  ;;  %s52_s16 = int_to_ptr.vmem [resolvable:$true] %s51_s16 }
  0x22   :  { %p358_p13 = scmp.ne.s32.totalorder %s598_s3, %s357_s19  ;;  %p361_p0 = scmp.lt.u32.totalorder %s357_s19, %s598_s3 }
  0x24   :  { %p363_p1 = pnand %p361_p0, %p358_p13 }
  0x26   :  { %366 = shalt.err (!%p363_p1)
}
  0x27   :  { %s367_s23 = scalar_lea.vmem %s52_s16, 192  ;;  %p372_p3 = scmp.lt.s32.totalorder %s52_s16, %s52_s16 }
  0x28   :  { %p368_p2 = scmp.ne.s32.totalorder %s52_s16, %s367_s23  ;;  %p373_p4 = scmp.lt.s32.totalorder %s367_s23, %s367_s23 }
  0x2a   :  { %p374_p5 = por %p373_p4, %p372_p3 }
  0x2c   :  { %p375_p6 = pnand %p374_p5, %p368_p2 }
  0x2e   :  { %378 = shalt.err (!%p375_p6)
}
  0x2f   :  { %s439_s24 = smov 64   ;;  %s440_s25 = smov 4  }
  0x30   :  { %57 = dma.hbm_to_vmem [thread:$0]  %s598_s3, 192, %s52_s16, [#allocation3], %s439_s24, %s439_s24, %s440_s25  }
  0x31   :  { %423 = dma.done.wait [#allocation5], 16  }
  0x32   :  { %424 = vsyncadd [#allocation5], 4294967280 }
  0x33   :  { %425 = dma.done.wait [#allocation6], 32  }
  0x34   :  { %426 = vsyncadd [#allocation6], 4294967264 }
  0x35   :  { %427 = dma.done.wait [#allocation9], 32  }
  0x36   :  { %428 = vsyncadd [#allocation9], 4294967264 }
  0x37   :  { %429 = dma.done.wait [#allocation3], 192  }
  0x38   :  { %430 = vsyncadd [#allocation3], 4294967104 }
  0x39   :  { %70 = sfence }
  0x3a   :  { %s71_s28 = sld [smem:[#allocation2]]  ;;  %s510_s30 = sld [smem:[#allocation8 + $0x1]]  ;;  %vm141_vm0 = vcmask 1040384   ;;  %vm143_vm1 = vcmask 1041408  }
  0x3b   :  { %s508_s29 = sld [smem:[#allocation8]]  ;;  %s512_s7 = sld [smem:[#allocation8 + $0x2]] }
  0x3c   :  { %s78_s8 = sld [smem:[#allocation7]]  ;;  %s292_s9 = sld [smem:[#allocation7 + $0x1]] }
  0x3d   :  { %s293_s1 = sld [smem:[#allocation7 + $0x2]]  ;;  %s294_s3 = sld [smem:[#allocation7 + $0x3]] }
  0x3e   :  { %s295_s10 = sld [smem:[#allocation7 + $0x4]]  ;;  %s514_s11 = sld [smem:[#allocation7 + $0x5]] }
  0x3f   :  { %s297_s12 = sld [smem:[#allocation7 + $0x6]]  ;;  %s298_s13 = sld [smem:[#allocation7 + $0x7]] }
  0x40   :  { %s289_s14 = sshll.u32 %s71_s28, 2  ;;  %s299_s0 = sld [smem:[#allocation7 + $0x8]]  ;;  %v114_v24 = vstv %s510_s30 }
  0x41   :  { %s516_s15 = sld [smem:[#allocation2 + $0x1]]  ;;  %s73_s16 = scalar_lea.vmem [#allocation10], %s289_s14  ;;  %v95_v23 = vstv %s508_s29  ;;  %v133_v26 = vstv %s512_s7 }
  0x42   :  { %v74_v0 = vld [vmem:[%s73_s16] sm:$0x7]  ;;  %v79_v1 = vstv %s78_s8  ;;  %v82_v2 = vstv %s292_s9  ;;  %s518_s17 = sld [smem:[#allocation7 + $0x80]]  ;;  %s521_s18 = sld [smem:[#allocation7 + $0x81]] }
  0x43   :  { %v89_v3 = vstv %s293_s1  ;;  %v98_v4 = vstv %s294_s3  ;;  %v80_v5 = vmul.f32 %v79_v1, %v74_v0  ;;  %v83_v6 = vmul.f32 %v82_v2, %v74_v0  ;;  %s523_s19 = sld [smem:[#allocation7 + $0x82]]  ;;  %s525_s20 = sld [smem:[#allocation7 + $0x83]] }
  0x44   :  { %v101_v7 = vstv %s295_s10  ;;  %v108_v8 = vstv %s514_s11  ;;  %v90_v9 = vmul.f32 %v89_v3, %v74_v0  ;;  %v99_v10 = vmul.f32 %v98_v4, %v74_v0  ;;  %s527_s21 = sld [smem:[#allocation7 + $0x84]]  ;;  %s529_s2 = sld [smem:[#allocation7 + $0x85]] }
  0x45   :  { %v117_v11 = vstv %s297_s12  ;;  %v120_v12 = vstv %s298_s13  ;;  %v85_v13 = vrot.slane %v83_v6, 1  ;;  %v102_v14 = vmul.f32 %v101_v7, %v74_v0  ;;  %s532_s23 = sld [smem:[#allocation7 + $0x86]]  ;;  %s537_s24 = sld [smem:[#allocation8 + $0x81]] }
  0x46   :  { %v118_v15 = vmul.f32 %v117_v11, %v74_v0  ;;  %v121_v16 = vmul.f32 %v120_v12, %v74_v0  ;;  %v127_v17 = vstv %s299_s0  ;;  %v92_v18 = vrot.slane %v90_v9, 2  ;;  %s542_s26 = sld [smem:[#allocation7 + $0x87]]  ;;  %s544_s27 = sld [smem:[#allocation7 + $0x88]] }
  0x47   :  { %v128_v19 = vmul.f32 %v127_v17, %v74_v0  ;;  %v87_v20 = vadd.f32 %v85_v13, %v80_v5  ;;  %v104_v21 = vrot.slane %v102_v14, 1  ;;  %v109_v22 = vmul.f32 %v108_v8, %v74_v0  ;;  %s301_s22 = sshll.u32 %s516_s15, 2  ;;  %s548_s28 = sld [smem:[#allocation8 + $0x80]] }
  0x48   :  { %v123_v25 = vrot.slane %v121_v16, 1  ;;  %s155_s25 = scalar_lea.vmem [#allocation10], %s301_s22  ;;  %v161_v33 = vstv %s518_s17  ;;  %v164_v34 = vstv %s521_s18  ;;  %s304_s29 = sld [smem:[#allocation8 + $0x82]] }
  0x49   :  { %v130_v27 = vrot.slane %v128_v19, 2  ;;  %v94_v28 = vadd.f32 %v92_v18, %v87_v20  ;;  %v106_v29 = vadd.f32 %v104_v21, %v99_v10  ;;  %v111_v30 = vrot.slane %v109_v22, 2  ;;  %v156_v32 = vld [vmem:[%s155_s25] sm:$0x7]  ;;  %s441_s1 = smov [#allocation11]  }
  0x4a   :  { %v125_v31 = vadd.f32 %v123_v25, %v118_v15  ;;  %v171_v35 = vstv %s523_s19  ;;  %v162_v38 = vmul.f32 %v161_v33, %v156_v32  ;;  %v165_v39 = vmul.f32 %v164_v34, %v156_v32  ;;  %s257_s3 = sshll.u32 %s441_s1, 4  ;;  %s258_s3 = int_to_ptr.vmem [resolvable:$true] %s257_s3 }
  0x4b   :  { %v96_v36 = vadd.f32 %v95_v23, %v94_v28  ;;  %v113_v37 = vadd.f32 %v111_v30, %v106_v29  ;;  %v172_v41 = vmul.f32 %v171_v35, %v156_v32  ;;  %v180_v42 = vstv %s525_s20  ;;  %s379_s10 = scalar_lea.vmem %s258_s3, 32  ;;  %p384_p8 = scmp.lt.s32.totalorder %s258_s3, %s258_s3 }
  0x4c   :  { %v132_v40 = vadd.f32 %v130_v27, %v125_v31  ;;  %v183_v43 = vstv %s527_s21  ;;  %v167_v45 = vrot.slane %v165_v39, 1  ;;  %v181_v46 = vmul.f32 %v180_v42, %v156_v32  ;;  %p380_p7 = scmp.ne.s32.totalorder %s258_s3, %s379_s10  ;;  %p385_p9 = scmp.lt.s32.totalorder %s379_s10, %s379_s10 }
  0x4d   :  { %v115_v44 = vadd.f32 %v114_v24, %v113_v37  ;;  %v184_v47 = vmul.f32 %v183_v43, %v156_v32  ;;  %v174_v49 = vrot.slane %v172_v41, 2  ;;  %v190_v50 = vstv %s529_s2 }
  0x4e   :  { %v134_v48 = vadd.f32 %v133_v26, %v132_v40  ;;  %v191_v53 = vmul.f32 %v190_v50, %v156_v32  ;;  %v199_v54 = vstv %s532_s23  ;;  %v169_v58 = vadd.f32 %v167_v45, %v162_v38  ;;  %p386_p10 = por %p385_p9, %p384_p8 }
  0x4f   :  { %v136_v51 = vrot.slane %v115_v44, 7  ;;  %v186_v52 = vrot.slane %v184_v47, 1  ;;  %v196_v63 = vstv %s537_s24  ;;  %v202_v0 = vstv %s542_s26 }
  0x50   :  { %v150_v55 = vsel %vm141_vm0, %v134_v48, -inf  ;;  %v139_v56 = vrot.slane %v134_v48, 6  ;;  %146 = vst [vmem:[#allocation11] sm:$0x1] %v134_v48  ;;  %v147_v57 = vsel %vm141_vm0, %v134_v48, inf  ;;  %v193_v61 = vrot.slane %v191_v53, 2  ;;  %p387_p11 = pnand %p386_p10, %p380_p7 }
  0x51   :  { %151 = vmax.xlane.f32.xlu0 %v150_v55  ;;  %v142_v59 = vsel %vm141_vm0, %v96_v36, %v136_v51  ;;  %148 = vmin.xlane.f32.xlu1 %v147_v57  ;;  %v188_v60 = vadd.f32 %v186_v52, %v181_v46  ;;  %v209_v1 = vstv %s544_s27  ;;  %v200_v3 = vmul.f32 %v199_v54, %v156_v32 }
  0x52   :  { %v144_v62 = vsel %vm143_vm1, %v142_v59, %v139_v56  ;;  %v203_v4 = vmul.f32 %v202_v0, %v156_v32  ;;  %v210_v5 = vmul.f32 %v209_v1, %v156_v32  ;;  %v176_v6 = vadd.f32 %v174_v49, %v169_v58 }
  0x53   :  { %145 = vst [vmem:[%s599_s4] sm:$0x7] %v144_v62  ;;  %v195_v2 = vadd.f32 %v193_v61, %v188_v60  ;;  %v177_v7 = vstv %s548_s28  ;;  %v215_v13 = vstv %s304_s29 }
  0x54   :  { %v205_v9 = vrot.slane %v203_v4, 1  ;;  %v212_v10 = vrot.slane %v210_v5, 2  ;;  %v178_v12 = vadd.f32 %v177_v7, %v176_v6 }
  0x55   :  { %v197_v8 = vadd.f32 %v196_v63, %v195_v2 }
  0x56   :  { %v207_v11 = vadd.f32 %v205_v9, %v200_v3 }
  0x57   :  { %v218_v14 = vrot.slane %v197_v8, 7 }
  0x58   :  { %v214_v15 = vadd.f32 %v212_v10, %v207_v11 }
  0x59   :  { %v223_v17 = vsel %vm141_vm0, %v178_v12, %v218_v14 }
  0x5a   :  { %v216_v16 = vadd.f32 %v215_v13, %v214_v15 }
  0x5c   :  { %v221_v18 = vrot.slane %v216_v16, 6  ;;  %v231_v19 = vsel %vm141_vm0, %v216_v16, -inf  ;;  %227 = vst [vmem:[#allocation11 + $0x1] sm:$0x1] %v216_v16  ;;  %v228_v20 = vsel %vm141_vm0, %v216_v16, inf }
  0x5d   :  { %232 = vmax.xlane.f32.xlu0 %v231_v19  ;;  %229 = vmin.xlane.f32.xlu1 %v228_v20 }
  0x5e   :  { %v224_v21 = vsel %vm143_vm1, %v223_v17, %v221_v18 }
  0x5f   :  { %314 = vst [vmem:[%s599_s4 + $0x4] sm:$0x7] %v224_v21 }
  0x60   :  { %390 = shalt.err (!%p387_p11)
}
  0x61   :  { %s391_s13 = scalar_lea.hbm %s600_s5, 32 }
  0x62   :  { %p392_p12 = scmp.ne.s32.totalorder %s600_s5, %s391_s13  ;;  %p395_p13 = scmp.lt.u32.totalorder %s391_s13, %s600_s5 }
  0x64   :  { %p397_p0 = pnand %p395_p13, %p392_p12 }
  0x66   :  { %400 = shalt.err (!%p397_p0)
}
  0x67   :  { %260 = dma.vmem_to_hbm [thread:$0]  %s258_s3, 32, %s600_s5, [#allocation4]  }
  0x68   :  { %s442_s18 = smov [#allocation12]  }
  0x69   :  { %s267_s19 = sshll.u32 %s442_s18, 4  ;;  %s268_s19 = int_to_ptr.vmem [resolvable:$true] %s267_s19 }
  0x6a   :  { %s401_s5 = scalar_lea.vmem %s268_s19, 32  ;;  %p406_p2 = scmp.lt.s32.totalorder %s268_s19, %s268_s19 }
  0x6b   :  { %p402_p1 = scmp.ne.s32.totalorder %s268_s19, %s401_s5  ;;  %p407_p3 = scmp.lt.s32.totalorder %s401_s5, %s401_s5 }
  0x6d   :  { %p408_p4 = por %p407_p3, %p406_p2 }
  0x6f   :  { %p409_p5 = pnand %p408_p4, %p402_p1 }
  0xde   :  { %v152_v22 = vpop.xlane.xlu0 %151  ;;  %v149_v23 = vpop.xlane.xlu1 %148 }
  0xea   :  { %v233_v24 = vpop.xlane.xlu0 %232  ;;  %v230_v25 = vpop.xlane.xlu1 %229 }
  0xeb   :  { %v235_v26 = vmax.f32 %v152_v22, %v233_v24  ;;  %v234_v27 = vmin.f32 %v149_v23, %v230_v25 }
  0xed   :  { %v240_v28 = vmul.f32 0.01, %v235_v26  ;;  %v237_v29 = vmul.f32 0.01, %v234_v27 }
  0xef   :  { %v241_v30 = vfloor.f32 %v240_v28  ;;  %v238_v32 = vfloor.f32 %v237_v29 }
  0xf1   :  { %v242_v31 = vadd.f32 1.0, %v241_v30  ;;  %v239_v35 = vmul.f32 100.0, %v238_v32 }
  0xf3   :  { %v243_v33 = vmul.f32 100.0, %v242_v31 }
  0xf5   :  { %v245_v34 = vrot.slane %v243_v33, 7 }
  0xf7   :  { %v247_v36 = vsel %vm141_vm0, %v239_v35, %v245_v34 }
  0xf8   :  { %248 = vst [vmem:[#allocation12] sm:$0x3] %v247_v36 }
  0xf9   :  { %412 = shalt.err (!%p409_p5)
}
  0xfa   :  { %s413_s2 = scalar_lea.hbm %s601_s6, 32 }
  0xfb   :  { %p414_p6 = scmp.ne.s32.totalorder %s601_s6, %s413_s2  ;;  %p417_p7 = scmp.lt.u32.totalorder %s413_s2, %s601_s6 }
  0xfd   :  { %p419_p8 = pnand %p417_p7, %p414_p6 }
  0xff   :  { %422 = shalt.err (!%p419_p8)
}
 0x100   :  { %270 = dma.vmem_to_hbm [thread:$0]  %s268_s19, 32, %s601_s6, [#allocation13]  }
 0x101   :  { %431 = dma.done.wait [#allocation4], 32  }
 0x102   :  { %432 = vsyncadd [#allocation4], 4294967264 }
 0x103   :  { %433 = dma.done.wait [#allocation13], 32  }
 0x104   :  { %434 = vsyncadd [#allocation13], 4294967264 }
 0x105   :  { %279 = vsyncpa [#allocation3], 1 }
 0x106   :  { %280 = vsyncpa [#allocation4], 1 }
 0x107   :  { %281 = vsyncpa [#allocation13], 1 }
 0x108   :  { %282 = vsyncpa [#allocation5], 1 }
 0x109   :  { %283 = vsyncpa [#allocation6], 1 }
 0x10a   :  { %284 = vsyncpa [#allocation9], 1 }

</bundles_post_ra>
